<compile_context>
chip_gen: v7x
topology: tpu7x:2x2x1
jax: 0.10.0
libtpu: 0.0.40
codegen_flags: <defaults>
</compile_context>

<pallas_src>
import functools

import jax
import jax.numpy as jnp
from jax.experimental import pallas as pl
from jax.experimental.pallas import tpu as pltpu


def encoder_kernel(x_ref, w1_ref, b1_ref, wh_ref, bh_ref, mu_ref, var_ref):
    # Two MXU matmuls entirely in VMEM; accumulate + elementwise in f32.
    x = x_ref[...]
    hidden = jnp.dot(x, w1_ref[...], preferred_element_type=jnp.float32) + b1_ref[...]
    hidden = jnp.maximum(hidden, 0.0)  # ReLU on the f32 accumulator
    out = jnp.dot(hidden.astype(wh_ref.dtype), wh_ref[...],
                  preferred_element_type=jnp.float32) + bh_ref[...]
    z = mu_ref.shape[-1]
    # Split the fused (tb, 2*z) slab into the two heads directly from vregs
    # (cheap masked stores) instead of slicing in the wrapper (extra HBM pass).
    mu_ref[...] = out[:, :z].astype(mu_ref.dtype)
    var_ref[...] = out[:, z:].astype(var_ref.dtype)


def prepare_encoder_params(w1, b1, wmu, bmu, wvar, bvar, dtype=None):
    """One-time parameter prep (do this at init, NOT per forward call).

    PyTorch nn.Linear stores weights as (out, in); the kernel wants (in, out)
    so the MXU matmul is a plain `x @ W`. The mu/var heads are fused along the
    output axis into a single weight/bias pair. Pass dtype=jnp.bfloat16 to
    halve weight HBM traffic (keep biases / accumulation in f32).
    """
    hidden_dim = w1.shape[0]
    z_dim = wmu.shape[0]
    w1_t = jnp.asarray(w1).T                                    # (in, hidden)
    b1_2d = jnp.asarray(b1).reshape(1, hidden_dim)              # (1, hidden)
    w_heads = jnp.concatenate([jnp.asarray(wmu).T,
                               jnp.asarray(wvar).T], axis=1)    # (hidden, 2*z)
    b_heads = jnp.concatenate([jnp.asarray(bmu),
                               jnp.asarray(bvar)]).reshape(1, 2 * z_dim)
    if dtype is not None:
        w1_t = w1_t.astype(dtype)
        w_heads = w_heads.astype(dtype)
    return w1_t, b1_2d, w_heads, b_heads, z_dim


def _round_up(n, m):
    return ((n + m - 1) // m) * m


@functools.partial(jax.jit, static_argnames=("z_dim", "tile_b"))
def encoder_forward(x, w1_t, b1_2d, w_heads, b_heads, *, z_dim, tile_b=4096):
    """x: (B, input_dim); params already prepared by `prepare_encoder_params`.

    Returns (z_mu, z_var), each (B, z_dim).
    """
    B, input_dim = x.shape
    hidden_dim = w1_t.shape[1]
    out_dim = 2 * z_dim

    # Batch tile: multiple of 8 (f32 sublane), capped by tile_b, and capped so
    # the grid has >= 2 steps when possible (lets v7x shard the "parallel"
    # batch axis across its two TensorCores; no effect on v5e/v6e).
    tb = min(tile_b, _round_up(pl.cdiv(B, 2), 8))
    tb = max(tb, 8)
    grid = (pl.cdiv(B, tb),)  # ragged last block handled by Pallas (OOB writes dropped)

    itemsize = jnp.dtype(x.dtype).itemsize
    cost = pl.CostEstimate(
        flops=2 * B * (input_dim * hidden_dim + hidden_dim * out_dim),
        transcendentals=0,
        bytes_accessed=(x.size * itemsize
                        + w1_t.size * jnp.dtype(w1_t.dtype).itemsize
                        + w_heads.size * jnp.dtype(w_heads.dtype).itemsize
                        + (b1_2d.size + b_heads.size) * 4
                        + B * out_dim * itemsize),
    )

    z_mu, z_var = pl.pallas_call(
        encoder_kernel,
        out_shape=(jax.ShapeDtypeStruct((B, z_dim), x.dtype),
                   jax.ShapeDtypeStruct((B, z_dim), x.dtype)),
        grid=grid,
        in_specs=[
            # Batch-tiled activations (per-step DMA, double-buffered).
            pl.BlockSpec((tb, input_dim), lambda i: (i, 0)),
            # Weights / biases: constant index_map -> resident in VMEM.
            pl.BlockSpec((input_dim, hidden_dim), lambda i: (0, 0)),
            pl.BlockSpec((1, hidden_dim), lambda i: (0, 0)),
            pl.BlockSpec((hidden_dim, out_dim), lambda i: (0, 0)),
            pl.BlockSpec((1, out_dim), lambda i: (0, 0)),
        ],
        out_specs=(
            pl.BlockSpec((tb, z_dim), lambda i: (i, 0)),
            pl.BlockSpec((tb, z_dim), lambda i: (i, 0)),
        ),
        compiler_params=pltpu.CompilerParams(
            dimension_semantics=("parallel",),
        ),
        cost_estimate=cost,
    )(x, w1_t, b1_2d, w_heads, b_heads)

    return z_mu, z_var


def _init_linear(key, out_dim, in_dim, dtype=jnp.float32):
    # Deterministic init mimicking nn.Linear's uniform(-1/sqrt(in), 1/sqrt(in)).
    kw, kb = jax.random.split(key)
    bound = 1.0 / jnp.sqrt(jnp.float32(in_dim))
    w = jax.random.uniform(kw, (out_dim, in_dim), dtype, -bound, bound)
    b = jax.random.uniform(kb, (out_dim,), dtype, -bound, bound)
    return w, b


def _reference(x, w1, b1, wmu, bmu, wvar, bvar):
    hidden = jnp.maximum(x @ w1.T + b1, 0.0)
    return hidden @ wmu.T + bmu, hidden @ wvar.T + bvar


if __name__ == "__main__":
    # Small shapes consistent with the module: input_dim=32, hidden=32, z=16.
    input_dim, hidden_dim, z_dim = 32, 32, 16

    key = jax.random.PRNGKey(0)
    kx, k1, k2, k3, kx2 = jax.random.split(key, 5)

    w1, b1 = _init_linear(k1, hidden_dim, input_dim)
    wmu, bmu = _init_linear(k2, z_dim, hidden_dim)
    wvar, bvar = _init_linear(k3, z_dim, hidden_dim)

    # One-time param prep (outside the hot path). For max bandwidth on large
    # batches pass dtype=jnp.bfloat16 here (and cast x); kept f32 for the
    # accuracy-checked test below.
    w1_t, b1_2d, w_heads, b_heads, zd = prepare_encoder_params(
        w1, b1, wmu, bmu, wvar, bvar)

    # Case 1: tiny batch (single grid step).
    x_small = jax.random.normal(kx, (8, input_dim), jnp.float32)
    mu_s, var_s = encoder_forward(x_small, w1_t, b1_2d, w_heads, b_heads, z_dim=zd)
    jax.block_until_ready((mu_s, var_s))
    mu_ref_s, var_ref_s = _reference(x_small, w1, b1, wmu, bmu, wvar, bvar)
    assert mu_s.shape == (8, z_dim) and var_s.shape == (8, z_dim)
    assert jnp.allclose(mu_s, mu_ref_s, atol=1e-5, rtol=1e-5)
    assert jnp.allclose(var_s, var_ref_s, atol=1e-5, rtol=1e-5)

    # Case 2: non-multiple batch to exercise the ragged last block + 2-step grid.
    x_big = jax.random.normal(kx2, (200, input_dim), jnp.float32)
    mu_b, var_b = encoder_forward(x_big, w1_t, b1_2d, w_heads, b_heads,
                                  z_dim=zd, tile_b=2048)
    jax.block_until_ready((mu_b, var_b))
    mu_ref_b, var_ref_b = _reference(x_big, w1, b1, wmu, bmu, wvar, bvar)
    assert mu_b.shape == (200, z_dim) and var_b.shape == (200, z_dim)
    assert jnp.allclose(mu_b, mu_ref_b, atol=1e-5, rtol=1e-5)
    assert jnp.allclose(var_b, var_ref_b, atol=1e-5, rtol=1e-5)

    print("KERNEL_OK")
</pallas_src>

<mosaic_0001>
module attributes {stable_mosaic.version = 11 : i64} {
  func.func @encoder_kernel(%arg0: i32, %arg1: memref<8x32xf32, #tpu.memory_space<vmem>>, %arg2: memref<32x32xf32, #tpu.memory_space<vmem>>, %arg3: memref<1x32xf32, #tpu.memory_space<vmem>>, %arg4: memref<32x32xf32, #tpu.memory_space<vmem>>, %arg5: memref<1x32xf32, #tpu.memory_space<vmem>>, %arg6: memref<8x16xf32, #tpu.memory_space<vmem>>, %arg7: memref<8x16xf32, #tpu.memory_space<vmem>>) attributes {dimension_semantics = [#tpu.dimension_semantics<parallel>], iteration_bounds = array<i64: 1>, scalar_prefetch = 0 : i64, scratch_operands = 0 : i64, tpu.core_type = #tpu.core_type<tc>, window_params = [{transform_indices = @transform_0, window_bounds = array<i64: 8, 32>}, {pipeline_mode = #tpu.pipeline_mode<synchronous>, transform_indices = @transform_1, window_bounds = array<i64: 32, 32>}, {pipeline_mode = #tpu.pipeline_mode<synchronous>, transform_indices = @transform_2, window_bounds = array<i64: 1, 32>}, {pipeline_mode = #tpu.pipeline_mode<synchronous>, transform_indices = @transform_3, window_bounds = array<i64: 32, 32>}, {pipeline_mode = #tpu.pipeline_mode<synchronous>, transform_indices = @transform_4, window_bounds = array<i64: 1, 32>}, {transform_indices = @transform_5, window_bounds = array<i64: 8, 16>}, {transform_indices = @transform_6, window_bounds = array<i64: 8, 16>}]} {
    %c0 = arith.constant 0 : index
    %c0_0 = arith.constant 0 : index
    %0 = vector.load %arg1[%c0, %c0_0] : memref<8x32xf32, #tpu.memory_space<vmem>>, vector<8x32xf32>
    %c0_1 = arith.constant 0 : index
    %c0_2 = arith.constant 0 : index
    %1 = vector.load %arg2[%c0_1, %c0_2] : memref<32x32xf32, #tpu.memory_space<vmem>>, vector<32x32xf32>
    %cst = arith.constant dense<0.000000e+00> : vector<8x32xf32>
    %2 = tpu.matmul %0, %1, %cst {dimension_numbers = #tpu.dot_dimension_numbers<[1], [0], [0], [1], [0, 0, 1, 1], [], []>} : vector<8x32xf32>, vector<32x32xf32>, vector<8x32xf32> -> vector<8x32xf32>
    %c0_3 = arith.constant 0 : index
    %c0_4 = arith.constant 0 : index
    %3 = vector.load %arg3[%c0_3, %c0_4] : memref<1x32xf32, #tpu.memory_space<vmem>>, vector<1x32xf32>
    %4 = vector.broadcast %3 : vector<1x32xf32> to vector<8x32xf32>
    %5 = arith.addf %2, %4 : vector<8x32xf32>
    %cst_5 = arith.constant 0.000000e+00 : f32
    %6 = vector.broadcast %cst_5 : f32 to vector<8x32xf32>
    %7 = arith.maximumf %5, %6 : vector<8x32xf32>
    %c0_6 = arith.constant 0 : index
    %c0_7 = arith.constant 0 : index
    %8 = vector.load %arg4[%c0_6, %c0_7] : memref<32x32xf32, #tpu.memory_space<vmem>>, vector<32x32xf32>
    %cst_8 = arith.constant dense<0.000000e+00> : vector<8x32xf32>
    %9 = tpu.matmul %7, %8, %cst_8 {dimension_numbers = #tpu.dot_dimension_numbers<[1], [0], [0], [1], [0, 0, 1, 1], [], []>} : vector<8x32xf32>, vector<32x32xf32>, vector<8x32xf32> -> vector<8x32xf32>
    %c0_9 = arith.constant 0 : index
    %c0_10 = arith.constant 0 : index
    %10 = vector.load %arg5[%c0_9, %c0_10] : memref<1x32xf32, #tpu.memory_space<vmem>>, vector<1x32xf32>
    %11 = vector.broadcast %10 : vector<1x32xf32> to vector<8x32xf32>
    %12 = arith.addf %9, %11 : vector<8x32xf32>
    %13 = vector.extract_strided_slice %12 {offsets = [0, 0], sizes = [8, 16], strides = [1, 1]} : vector<8x32xf32> to vector<8x16xf32>
    %c0_11 = arith.constant 0 : index
    %c0_12 = arith.constant 0 : index
    %14 = vector.load %arg6[%c0_11, %c0_12] : memref<8x16xf32, #tpu.memory_space<vmem>>, vector<8x16xf32>
    tpu.vector_store %arg6[%c0_11, %c0_12], %13 {strides = array<i32>} : memref<8x16xf32, #tpu.memory_space<vmem>>, vector<8x16xf32>,
    %15 = vector.extract_strided_slice %12 {offsets = [0, 16], sizes = [8, 16], strides = [1, 1]} : vector<8x32xf32> to vector<8x16xf32>
    %c0_13 = arith.constant 0 : index
    %c0_14 = arith.constant 0 : index
    %16 = vector.load %arg7[%c0_13, %c0_14] : memref<8x16xf32, #tpu.memory_space<vmem>>, vector<8x16xf32>
    tpu.vector_store %arg7[%c0_13, %c0_14], %15 {strides = array<i32>} : memref<8x16xf32, #tpu.memory_space<vmem>>, vector<8x16xf32>,
    return
  }
  func.func @transform_0(%arg0: i32) -> (i32, i32) {
    %c0_i32 = arith.constant 0 : i32
    %c0_i32_0 = arith.constant 0 : i32
    return %arg0, %c0_i32 : i32, i32
  }
  func.func @transform_1(%arg0: i32) -> (i32, i32) {
    %c0_i32 = arith.constant 0 : i32
    %c0_i32_0 = arith.constant 0 : i32
    %c0_i32_1 = arith.constant 0 : i32
    return %c0_i32, %c0_i32_0 : i32, i32
  }
  func.func @transform_2(%arg0: i32) -> (i32, i32) {
    %c0_i32 = arith.constant 0 : i32
    %c0_i32_0 = arith.constant 0 : i32
    %c0_i32_1 = arith.constant 0 : i32
    return %c0_i32, %c0_i32_0 : i32, i32
  }
  func.func @transform_3(%arg0: i32) -> (i32, i32) {
    %c0_i32 = arith.constant 0 : i32
    %c0_i32_0 = arith.constant 0 : i32
    %c0_i32_1 = arith.constant 0 : i32
    return %c0_i32, %c0_i32_0 : i32, i32
  }
  func.func @transform_4(%arg0: i32) -> (i32, i32) {
    %c0_i32 = arith.constant 0 : i32
    %c0_i32_0 = arith.constant 0 : i32
    %c0_i32_1 = arith.constant 0 : i32
    return %c0_i32, %c0_i32_0 : i32, i32
  }
  func.func @transform_5(%arg0: i32) -> (i32, i32) {
    %c0_i32 = arith.constant 0 : i32
    %c0_i32_0 = arith.constant 0 : i32
    return %arg0, %c0_i32 : i32, i32
  }
  func.func @transform_6(%arg0: i32) -> (i32, i32) {
    %c0_i32 = arith.constant 0 : i32
    %c0_i32_0 = arith.constant 0 : i32
    return %arg0, %c0_i32 : i32, i32
  }
}

</mosaic_0001>

<bundles_post_ra>
// kernel: encoder_forward.1
= control target key start
LH: loop header
LB: loop body
LE: loop exit
PB: predicated region body
PF: predicated region fallthrough
CT: control target
= control target key end

     0   :  { %12 = vsyncpa [#allocation3], 0  ;;  %s568_s0 = inlined_call_operand.hbm [shape: f32[8,32], index: 0, kind: input, shape index: {}]   ;;  %s569_s1 = inlined_call_operand.hbm [shape: f32[32,32], index: 1, kind: input, shape index: {}]   ;;  %s570_s2 = inlined_call_operand.vmem [shape: f32[1,32], index: 2, kind: input, shape index: {}]   ;;  %s571_s3 = inlined_call_operand.hbm [shape: f32[32,32], index: 3, kind: input, shape index: {}]   ;;  %s572_s4 = inlined_call_operand.vmem [shape: f32[1,32], index: 4, kind: input, shape index: {}]   ;;  %s573_s5 = inlined_call_operand.hbm [shape: f32[8,16], index: 5, kind: output, shape index: {0}]   ;;  %s574_s6 = inlined_call_operand.hbm [shape: f32[8,16], index: 6, kind: output, shape index: {1}]  }
   0x1   :  { %13 = vsyncpa [#allocation6], 0 }
   0x2   :  { %14 = vsyncpa [#allocation4], 0 }
   0x3   :  { %15 = vsyncpa [#allocation10], 0  ;;  %s448_s21 = smov [#allocation5]   ;;  %s330_s25 = scalar_lea.hbm %s569_s1, 512 }
   0x4   :  { %s31_s22 = sshll.u32 %s448_s21, 4  ;;  %p331_p0 = scmp.ne.s32.totalorder %s569_s1, %s330_s25  ;;  %s32_s22 = int_to_ptr.vmem [resolvable:$true] %s31_s22 }
   0x5   :  { %p334_p1 = scmp.lt.u32.totalorder %s330_s25, %s569_s1 }
   0x7   :  { %p336_p2 = pnand %p334_p1, %p331_p0 }
   0x9   :  { %339 = shalt.err (!%p336_p2)
}
   0xa   :  { %s340_s30 = scalar_lea.vmem %s32_s22, 512  ;;  %p345_p4 = scmp.lt.s32.totalorder %s32_s22, %s32_s22 }
   0xb   :  { %p341_p3 = scmp.ne.s32.totalorder %s32_s22, %s340_s30  ;;  %p346_p5 = scmp.lt.s32.totalorder %s340_s30, %s340_s30 }
   0xd   :  { %p347_p6 = por %p346_p5, %p345_p4 }
   0xf   :  { %p348_p7 = pnand %p347_p6, %p341_p3 }
  0x11   :  { %351 = shalt.err (!%p348_p7)
}
  0x12   :  { %s449_s7 = smov 128   ;;  %s450_s8 = smov 8  }
  0x13   :  { %37 = dma.hbm_to_vmem [thread:$0]  %s569_s1, 512, %s32_s22, [#allocation6], %s449_s7, %s449_s7, %s450_s8  }
  0x14   :  { %s451_s11 = smov [#allocation2]   ;;  %s452_s13 = smov [#allocation7]  }
  0x15   :  { %s22_s12 = sshll.u32 %s451_s11, 4  ;;  %s45_s14 = sshll.u32 %s452_s13, 4  ;;  %s23_s12 = int_to_ptr.vmem [resolvable:$true] %s22_s12  ;;  %s46_s14 = int_to_ptr.vmem [resolvable:$true] %s45_s14 }
  0x16   :  { %s352_s17 = scalar_lea.hbm %s568_s0, 128 }
  0x17   :  { %p353_p8 = scmp.ne.s32.totalorder %s568_s0, %s352_s17  ;;  %p356_p9 = scmp.lt.u32.totalorder %s352_s17, %s568_s0 }
  0x19   :  { %p358_p10 = pnand %p356_p9, %p353_p8 }
  0x1b   :  { %361 = shalt.err (!%p358_p10)
}
  0x1c   :  { %s362_s1 = scalar_lea.vmem %s23_s12, 128  ;;  %p367_p12 = scmp.lt.s32.totalorder %s23_s12, %s23_s12 }
  0x1d   :  { %p363_p11 = scmp.ne.s32.totalorder %s23_s12, %s362_s1  ;;  %p368_p13 = scmp.lt.s32.totalorder %s362_s1, %s362_s1 }
  0x1f   :  { %p369_p0 = por %p368_p13, %p367_p12 }
  0x21   :  { %p370_p1 = pnand %p369_p0, %p363_p11 }
  0x23   :  { %373 = shalt.err (!%p370_p1)
}
  0x24   :  { %25 = dma.hbm_to_vmem [thread:$0]  %s568_s0, 128, %s23_s12, [#allocation3]  }
  0x25   :  { %s374_s26 = scalar_lea.hbm %s571_s3, 512 }
  0x26   :  { %p375_p2 = scmp.ne.s32.totalorder %s571_s3, %s374_s26  ;;  %p378_p3 = scmp.lt.u32.totalorder %s374_s26, %s571_s3 }
  0x28   :  { %p380_p4 = pnand %p378_p3, %p375_p2 }
  0x2a   :  { %383 = shalt.err (!%p380_p4)
}
  0x2b   :  { %s384_s9 = scalar_lea.vmem %s46_s14, 512  ;;  %p389_p6 = scmp.lt.s32.totalorder %s46_s14, %s46_s14 }
  0x2c   :  { %p385_p5 = scmp.ne.s32.totalorder %s46_s14, %s384_s9  ;;  %p390_p7 = scmp.lt.s32.totalorder %s384_s9, %s384_s9 }
  0x2e   :  { %p391_p8 = por %p390_p7, %p389_p6 }
  0x30   :  { %p392_p9 = pnand %p391_p8, %p385_p5 }
  0x32   :  { %395 = shalt.err (!%p392_p9)
}
  0x33   :  { %51 = dma.hbm_to_vmem [thread:$0]  %s571_s3, 512, %s46_s14, [#allocation6], %s449_s7, %s449_s7, %s450_s8  }
  0x34   :  { %440 = dma.done.wait [#allocation3], 128  }
  0x35   :  { %441 = vsyncadd [#allocation3], 4294967168 }
  0x36   :  { %442 = dma.done.wait [#allocation6], 1024  }
  0x37   :  { %443 = vsyncadd [#allocation6], 4294966272  ;;  %v453_v0 = vmov 0.0|0.0   ;;  %vm454_vm0 = vmmov 0   ;;  %v455_v1 = vmov 0.0   ;;  %v64_v2 = vld [vmem:[#allocation5] sm:$0xff] }
  0x38   :  { %307 = vmatprep.subr.bf16.mxu0 %v453_v0  ;;  %293 = vmatprep.mubr.msk.f32.mxu0 %vm454_vm0, %v455_v1  ;;  %v65_v3 = vld [vmem:[#allocation5 + $0x8] sm:$0xff]  ;;  %v66_v4 = vld [vmem:[#allocation5 + $0x10] sm:$0xff]  ;;  %v67_v6 = vld [vmem:[#allocation5 + $0x18] sm:$0xff]  ;;  %vm75_vm1 = vcmask 261120   ;;  %s456_s12 = smov [#allocation8]   ;;  %vm234_vm2 = vcmask 130048  }
  0x39   :  { %313 = vmatprep.subr.bf16.mxu1 %v453_v0  ;;  %304 = vmatprep.mubr.msk.f32.mxu1 %vm454_vm0, %v455_v1  ;;  %v308_v5 = vpack.c.bf16 %v65_v3, %v64_v2  ;;  %v150_v7 = vld [vmem:[#allocation7] sm:$0xff]  ;;  %v151_v8 = vld [vmem:[#allocation7 + $0x8] sm:$0xff]  ;;  %v311_v9 = vpack.c.bf16 %v67_v6, %v66_v4  ;;  %v63_v11 = vld [vmem:[#allocation2] sm:$0xff]  ;;  %s247_s13 = sshll.u32 %s456_s12, 4  ;;  %s457_s14 = smov 112   ;;  %s248_s13 = int_to_ptr.vmem [resolvable:$true] %s247_s13 }
  0x3a   :  { %v314_v10 = vpack.c.bf16 %v151_v8, %v150_v7  ;;  %v152_v12 = vld [vmem:[#allocation7 + $0x10] sm:$0xff]  ;;  %v153_v13 = vld [vmem:[#allocation7 + $0x18] sm:$0xff]  ;;  %p401_p11 = scmp.lt.s32.totalorder %s248_s13, %s248_s13 }
  0x3b   :  { %309 = vmatpush3.bf16.msra.mxu0 %v308_v5  ;;  %v317_v14 = vpack.c.bf16 %v153_v13, %v152_v12  ;;  %v271_v15 = vld [vmem:[%s570_s2] ss:$0 sm:$0xff]  ;;  %s396_s2 = scalar_lea.vmem %s248_s13, 128 }
  0x3c   :  { %310 = vmatprep.subr.bf16.mxu0 %v453_v0  ;;  %315 = vmatpush3.bf16.msra.mxu1 %v314_v10  ;;  %v273_v20 = vld [vmem:[%s572_s4] ss:$0 sm:$0xff]  ;;  %p397_p10 = scmp.ne.s32.totalorder %s248_s13, %s396_s2  ;;  %p402_p12 = scmp.lt.s32.totalorder %s396_s2, %s396_s2 }
  0x3d   :  { %316 = vmatprep.subr.bf16.mxu1 %v453_v0 }
  0x3e   :  { %p403_p13 = por %p402_p12, %p401_p11 }
  0x3f   :  { %312 = vmatpush3.bf16.msra.mxu0 %v311_v9 }
  0x40   :  { %318 = vmatpush3.bf16.msra.mxu1 %v317_v14  ;;  %p404_p0 = pnand %p403_p13, %p397_p10 }
  0x42   :  { %294 = vmatmul.mubr.msk.f32.vlgmr.msra.gmra.mrb[0].mxu0 %vm75_vm1, %v63_v11 }
 0x115   :  { %v145_v16 = vpop.f32.mrb[0].mxu0 }
 0x116   :  { %v146_v17 = vadd.f32 %v271_v15, %v145_v16  ;;  %v295_v18 = vpop.f32.mrb[1].mxu0 }
 0x118   :  { %v149_v19 = vmax.f32 %v146_v17, 0.0 }
 0x11a   :  { %305 = vmatmul.mubr.msk.f32.vlgmr.msra.gmra.mrb[0].mxu1 %vm75_vm1, %v149_v19 }
 0x1ed   :  { %v230_v21 = vpop.f32.mrb[0].mxu1 }
 0x1ee   :  { %v231_v22 = vadd.f32 %v273_v20, %v230_v21  ;;  %v306_v23 = vpop.f32.mrb[1].mxu1 }
 0x1f0   :  { %237 = vrot.lane.b32.xlu0 %v231_v22, %s457_s14  ;;  %235 = vst.msk [vmem:[#allocation8] sm:$0xff] %vm234_vm2, %v231_v22 }
 0x1f1   :  { %407 = shalt.err (!%p404_p0)
}
 0x1f2   :  { %s408_s16 = scalar_lea.hbm %s573_s5, 128 }
 0x1f3   :  { %p409_p1 = scmp.ne.s32.totalorder %s573_s5, %s408_s16  ;;  %p412_p2 = scmp.lt.u32.totalorder %s408_s16, %s573_s5 }
 0x1f5   :  { %p414_p3 = pnand %p412_p2, %p409_p1 }
 0x1f7   :  { %417 = shalt.err (!%p414_p3)
}
 0x1f8   :  { %250 = dma.vmem_to_hbm [thread:$0]  %s248_s13, 128, %s573_s5, [#allocation4]  }
 0x1f9   :  { %s458_s22 = smov [#allocation9]  }
 0x1fa   :  { %s257_s23 = sshll.u32 %s458_s22, 4  ;;  %s258_s23 = int_to_ptr.vmem [resolvable:$true] %s257_s23 }
 0x1fb   :  { %s418_s24 = scalar_lea.vmem %s258_s23, 128  ;;  %p423_p5 = scmp.lt.s32.totalorder %s258_s23, %s258_s23 }
 0x1fc   :  { %p419_p4 = scmp.ne.s32.totalorder %s258_s23, %s418_s24  ;;  %p424_p6 = scmp.lt.s32.totalorder %s418_s24, %s418_s24 }
 0x1fe   :  { %p425_p7 = por %p424_p6, %p423_p5 }
 0x200   :  { %p426_p8 = pnand %p425_p7, %p419_p4 }
 0x262   :  { %v238_v24 = vpop.permute.xlu0 %237 }
 0x263   :  { %240 = vst.msk [vmem:[#allocation9] sm:$0xff] %vm234_vm2, %v238_v24 }
 0x264   :  { %429 = shalt.err (!%p426_p8)
}
 0x265   :  { %s430_s27 = scalar_lea.hbm %s574_s6, 128 }
 0x266   :  { %p431_p9 = scmp.ne.s32.totalorder %s574_s6, %s430_s27  ;;  %p434_p10 = scmp.lt.u32.totalorder %s430_s27, %s574_s6 }
 0x268   :  { %p436_p11 = pnand %p434_p10, %p431_p9 }
 0x26a   :  { %439 = shalt.err (!%p436_p11)
}
 0x26b   :  { %260 = dma.vmem_to_hbm [thread:$0]  %s258_s23, 128, %s574_s6, [#allocation10]  }
 0x26c   :  { %444 = dma.done.wait [#allocation4], 128  }
 0x26d   :  { %445 = vsyncadd [#allocation4], 4294967168 }
 0x26e   :  { %446 = dma.done.wait [#allocation10], 128  }
 0x26f   :  { %447 = vsyncadd [#allocation10], 4294967168 }
 0x270   :  { %267 = vsyncpa [#allocation3], 1 }
 0x271   :  { %268 = vsyncpa [#allocation6], 1 }
 0x272   :  { %269 = vsyncpa [#allocation4], 1 }
 0x273   :  { %270 = vsyncpa [#allocation10], 1 }

</bundles_post_ra>
